<compile_context>
chip_gen: v7x
topology: tpu7x:2x2x1
jax: 0.10.0
libtpu: 0.0.40
codegen_flags: <defaults>
</compile_context>

<pallas_src>
import functools

import jax
import jax.numpy as jnp
from jax import lax
from jax.experimental import pallas as pl
from jax.experimental.pallas import tpu as pltpu


def _pick_hw_tile(hw, c, itemsize, budget_bytes=8 << 20):
    """Largest lane tile (multiple of 128) s.t. two pipeline buffers of the
    (C, HW_TILE) x-block fit in `budget_bytes`. Falls back to the full spatial
    extent for small inputs (full-extent last dims are always legal blocks)."""
    per_lane = 2 * c * itemsize  # double-buffered bytes per lane column
    max_tile = max(128, (budget_bytes // per_lane) // 128 * 128)
    if hw <= max_tile:
        return hw
    return max_tile


def _channel_attention_kernel(x_ref, w1_ref, w2_ref, o_ref, sum_acc, max_acc,
                              *, hw_total, hw_tile, need_mask):
    # x_ref   : (C, HW_TILE) block of one batch; channels on sublanes, spatial on lanes
    # w1_ref  : (Ch, C)  first 1x1 conv weight (native PyTorch layout)
    # w2_ref  : (C, Ch)  second 1x1 conv weight (native PyTorch layout)
    # o_ref   : (C, 1)   per-batch sigmoid attention
    # sum_acc : (C, 1) f32 running spatial sum  (persists across HW grid steps)
    # max_acc : (C, 1) f32 running spatial max
    h = pl.program_id(1)
    n_h = pl.num_programs(1)

    @pl.when(h == 0)
    def _init():
        sum_acc[...] = jnp.zeros_like(sum_acc)
        max_acc[...] = jnp.full_like(max_acc, -jnp.inf)

    # Load at input width (bf16 stays bf16 on the wire), accumulate in f32.
    xt = x_ref[...].astype(jnp.float32)  # (C, HW_TILE)

    if need_mask:
        # Last spatial tile overhangs the array; mask the padded lanes.
        lane = lax.broadcasted_iota(jnp.int32, xt.shape, 1)
        valid = (h * hw_tile + lane) < hw_total
        x_sum = jnp.where(valid, xt, 0.0)
        x_max = jnp.where(valid, xt, -jnp.inf)
    else:
        x_sum = xt
        x_max = xt

    sum_acc[...] += jnp.sum(x_sum, axis=-1, keepdims=True)                       # (C, 1)
    max_acc[...] = jnp.maximum(max_acc[...], jnp.max(x_max, axis=-1, keepdims=True))

    @pl.when(h == n_h - 1)
    def _finalize():
        avg = sum_acc[...] * (1.0 / float(hw_total))     # (C, 1)
        mx = max_acc[...]                                 # (C, 1)
        v = jnp.concatenate([avg, mx], axis=1)            # (C, 2): [avg | max]

        w1 = w1_ref[...].astype(jnp.float32)              # (Ch, C)
        w2 = w2_ref[...].astype(jnp.float32)              # (C, Ch)

        # Shared MLP, one pass for both pooled vectors:
        #   (Ch, C) @ (C, 2) -> ReLU -> (C, Ch) @ (Ch, 2) -> (C, 2)
        hid = jnp.maximum(jnp.dot(w1, v, preferred_element_type=jnp.float32), 0.0)
        z2 = jnp.dot(w2, hid, preferred_element_type=jnp.float32)
        z = jnp.sum(z2, axis=1, keepdims=True)             # mlp(avg) + mlp(max), (C, 1)

        o_ref[...] = (1.0 / (1.0 + jnp.exp(-z))).astype(o_ref.dtype)   # sigmoid


def channel_attention(x_nchw, w1, w2, *, hw_tile=None, vmem_budget_bytes=8 << 20):
    """x_nchw: (B, C, H, W); w1: (Ch, C) [Conv2d(C, Ch, 1)]; w2: (C, Ch)."""
    B, C, H, W = x_nchw.shape
    Ch = w1.shape[0]
    HW = H * W

    # Contiguous reshape only (no transpose, no extra HBM pass).
    x_flat = x_nchw.reshape(B, C, HW)

    itemsize = jnp.dtype(x_nchw.dtype).itemsize
    if hw_tile is None:
        hw_tile = _pick_hw_tile(HW, C, itemsize, vmem_budget_bytes)
    n_hw = pl.cdiv(HW, hw_tile)
    need_mask = (HW % hw_tile) != 0

    kernel = functools.partial(
        _channel_attention_kernel,
        hw_total=HW, hw_tile=hw_tile, need_mask=need_mask,
    )

    out = pl.pallas_call(
        kernel,
        out_shape=jax.ShapeDtypeStruct((B, C, 1), x_nchw.dtype),
        grid_spec=pltpu.PrefetchScalarGridSpec(
            num_scalar_prefetch=0,
            grid=(B, n_hw),
            in_specs=[
                # x: one batch, all channels, one spatial tile (leading dim squeezed).
                pl.BlockSpec((None, C, hw_tile), lambda b, h: (b, 0, h)),
                # Weights: constant block index -> DMA'd once, VMEM-resident.
                pl.BlockSpec((Ch, C), lambda b, h: (0, 0)),
                pl.BlockSpec((C, Ch), lambda b, h: (0, 0)),
            ],
            out_specs=pl.BlockSpec((None, C, 1), lambda b, h: (b, 0, 0)),
            scratch_shapes=[
                pltpu.VMEM((C, 1), jnp.float32),   # running sum
                pltpu.VMEM((C, 1), jnp.float32),   # running max
            ],
        ),
        compiler_params=pltpu.CompilerParams(
            dimension_semantics=("parallel", "arbitrary"),
            vmem_limit_bytes=32 * 1024 * 1024,
        ),
    )(x_flat, w1, w2)

    return out.reshape(B, C, 1, 1)


def channel_attention_ref(x_nchw, w1, w2):
    """Pure-JAX reference mirroring the PyTorch module."""
    B, C, H, W = x_nchw.shape
    avg = jnp.mean(x_nchw, axis=(2, 3))  # (B, C)
    mx = jnp.max(x_nchw, axis=(2, 3))    # (B, C)

    def mlp(v):
        h = jnp.maximum(v @ w1.T, 0.0)
        return h @ w2.T

    z = mlp(avg) + mlp(mx)
    return jax.nn.sigmoid(z).reshape(B, C, 1, 1)


if __name__ == "__main__":
    key = jax.random.PRNGKey(0)
    kx, k1, k2, kx2 = jax.random.split(key, 4)

    B, C, H, W = 2, 64, 16, 16
    ratio = 16
    Ch = C // ratio  # 4

    x = jax.random.normal(kx, (B, C, H, W), dtype=jnp.float32)
    w1 = jax.random.normal(k1, (Ch, C), dtype=jnp.float32) * 0.1  # Conv2d(C, Ch, 1), no bias
    w2 = jax.random.normal(k2, (C, Ch), dtype=jnp.float32) * 0.1  # Conv2d(Ch, C, 1), no bias

    # 1) Default tiling (single spatial tile at this small size).
    out = jax.block_until_ready(channel_attention(x, w1, w2))
    ref = channel_attention_ref(x, w1, w2)
    assert out.shape == (B, C, 1, 1)
    assert jnp.allclose(out, ref, atol=1e-5, rtol=1e-5), "mismatch vs reference (default tile)"

    # 2) Forced multi-tile + ragged spatial extent (exercises the running
    #    sum/max accumulation, pl.when init/finalize, and tail masking).
    x2 = jax.random.normal(kx2, (B, C, 18, 18), dtype=jnp.float32)  # HW = 324
    out2 = jax.block_until_ready(channel_attention(x2, w1, w2, hw_tile=128))
    ref2 = channel_attention_ref(x2, w1, w2)
    assert jnp.allclose(out2, ref2, atol=1e-5, rtol=1e-5), "mismatch vs reference (tiled/masked)"

    print("KERNEL_OK")
</pallas_src>

<mosaic_0001>
module attributes {stable_mosaic.version = 11 : i64} {
  func.func @_channel_attention_kernel(%arg0: i32, %arg1: i32, %arg2: memref<1x64x256xf32, #tpu.memory_space<vmem>>, %arg3: memref<4x64xf32, #tpu.memory_space<vmem>>, %arg4: memref<64x4xf32, #tpu.memory_space<vmem>>, %arg5: memref<1x64x1xf32, #tpu.memory_space<vmem>>, %arg6: memref<64x1xf32, #tpu.memory_space<vmem>>, %arg7: memref<64x1xf32, #tpu.memory_space<vmem>>) attributes {dimension_semantics = [#tpu.dimension_semantics<parallel>, #tpu.dimension_semantics<arbitrary>], iteration_bounds = array<i64: 2, 1>, scalar_prefetch = 0 : i64, scratch_operands = 2 : i64, tpu.core_type = #tpu.core_type<tc>, window_params = [{transform_indices = @transform_0, window_bounds = array<i64: 1, 64, 256>}, {pipeline_mode = #tpu.pipeline_mode<synchronous>, transform_indices = @transform_1, window_bounds = array<i64: 4, 64>}, {pipeline_mode = #tpu.pipeline_mode<synchronous>, transform_indices = @transform_2, window_bounds = array<i64: 64, 4>}, {transform_indices = @transform_3, window_bounds = array<i64: 1, 64, 1>}]} {
    %c0_i32 = arith.constant 0 : i32
    %0 = arith.cmpi eq, %arg1, %c0_i32 : i32
    %1 = arith.extui %0 : i1 to i32
    %c0_i32_0 = arith.constant 0 : i32
    %2 = arith.cmpi ne, %1, %c0_i32_0 : i32
    scf.if %2 {
      %cst_14 = arith.constant 0.000000e+00 : f32
      %18 = vector.broadcast %cst_14 : f32 to vector<64x1xf32>
      %c0_15 = arith.constant 0 : index
      %c0_16 = arith.constant 0 : index
      %19 = vector.load %arg6[%c0_15, %c0_16] : memref<64x1xf32, #tpu.memory_space<vmem>>, vector<64x1xf32>
      tpu.vector_store %arg6[%c0_15, %c0_16], %18 {strides = array<i32>} : memref<64x1xf32, #tpu.memory_space<vmem>>, vector<64x1xf32>,
      %cst_17 = arith.constant 0xFF800000 : f32
      %20 = vector.broadcast %cst_17 : f32 to vector<64x1xf32>
      %c0_18 = arith.constant 0 : index
      %c0_19 = arith.constant 0 : index
      %21 = vector.load %arg7[%c0_18, %c0_19] : memref<64x1xf32, #tpu.memory_space<vmem>>, vector<64x1xf32>
      tpu.vector_store %arg7[%c0_18, %c0_19], %20 {strides = array<i32>} : memref<64x1xf32, #tpu.memory_space<vmem>>, vector<64x1xf32>,
    } else {
    }
    %c0 = arith.constant 0 : index
    %c0_1 = arith.constant 0 : index
    %c0_2 = arith.constant 0 : index
    %3 = vector.load %arg2[%c0, %c0_1, %c0_2] : memref<1x64x256xf32, #tpu.memory_space<vmem>>, vector<1x64x256xf32>
    %4 = vector.shape_cast %3 : vector<1x64x256xf32> to vector<64x256xf32>
    %c0_3 = arith.constant 0 : index
    %c0_4 = arith.constant 0 : index
    %5 = vector.load %arg6[%c0_3, %c0_4] : memref<64x1xf32, #tpu.memory_space<vmem>>, vector<64x1xf32>
    %cst = arith.constant dense<0.000000e+00> : vector<64xf32>
    %6 = vector.multi_reduction <add>, %4, %cst [1] : vector<64x256xf32> to vector<64xf32>
    %7 = vector.shape_cast %6 : vector<64xf32> to vector<64x1xf32>
    %8 = arith.addf %5, %7 : vector<64x1xf32>
    %c0_5 = arith.constant 0 : index
    %c0_6 = arith.constant 0 : index
    %9 = vector.load %arg6[%c0_5, %c0_6] : memref<64x1xf32, #tpu.memory_space<vmem>>, vector<64x1xf32>
    tpu.vector_store %arg6[%c0_5, %c0_6], %8 {strides = array<i32>} : memref<64x1xf32, #tpu.memory_space<vmem>>, vector<64x1xf32>,
    %c0_7 = arith.constant 0 : index
    %c0_8 = arith.constant 0 : index
    %10 = vector.load %arg7[%c0_7, %c0_8] : memref<64x1xf32, #tpu.memory_space<vmem>>, vector<64x1xf32>
    %cst_9 = arith.constant dense<0xFF800000> : vector<64xf32>
    %11 = vector.multi_reduction <maximumf>, %4, %cst_9 [1] : vector<64x256xf32> to vector<64xf32>
    %12 = vector.shape_cast %11 : vector<64xf32> to vector<64x1xf32>
    %13 = arith.maximumf %10, %12 : vector<64x1xf32>
    %c0_10 = arith.constant 0 : index
    %c0_11 = arith.constant 0 : index
    %14 = vector.load %arg7[%c0_10, %c0_11] : memref<64x1xf32, #tpu.memory_space<vmem>>, vector<64x1xf32>
    tpu.vector_store %arg7[%c0_10, %c0_11], %13 {strides = array<i32>} : memref<64x1xf32, #tpu.memory_space<vmem>>, vector<64x1xf32>,
    %c0_i32_12 = arith.constant 0 : i32
    %15 = arith.cmpi eq, %arg1, %c0_i32_12 : i32
    %16 = arith.extui %15 : i1 to i32
    %c0_i32_13 = arith.constant 0 : i32
    %17 = arith.cmpi ne, %16, %c0_i32_13 : i32
    scf.if %17 {
      %c0_14 = arith.constant 0 : index
      %c0_15 = arith.constant 0 : index
      %18 = vector.load %arg6[%c0_14, %c0_15] : memref<64x1xf32, #tpu.memory_space<vmem>>, vector<64x1xf32>
      %cst_16 = arith.constant 3.906250e-03 : f32
      %19 = vector.broadcast %cst_16 : f32 to vector<64x1xf32>
      %20 = arith.mulf %18, %19 : vector<64x1xf32>
      %c0_17 = arith.constant 0 : index
      %c0_18 = arith.constant 0 : index
      %21 = vector.load %arg7[%c0_17, %c0_18] : memref<64x1xf32, #tpu.memory_space<vmem>>, vector<64x1xf32>
      %22 = tpu.concatenate %20, %21 in 1 : vector<64x1xf32>, vector<64x1xf32> -> vector<64x2xf32>
      %c0_19 = arith.constant 0 : index
      %c0_20 = arith.constant 0 : index
      %23 = vector.load %arg3[%c0_19, %c0_20] : memref<4x64xf32, #tpu.memory_space<vmem>>, vector<4x64xf32>
      %c0_21 = arith.constant 0 : index
      %c0_22 = arith.constant 0 : index
      %24 = vector.load %arg4[%c0_21, %c0_22] : memref<64x4xf32, #tpu.memory_space<vmem>>, vector<64x4xf32>
      %cst_23 = arith.constant dense<0.000000e+00> : vector<4x2xf32>
      %25 = tpu.matmul %23, %22, %cst_23 {dimension_numbers = #tpu.dot_dimension_numbers<[1], [0], [0], [1], [0, 0, 1, 1], [], []>} : vector<4x64xf32>, vector<64x2xf32>, vector<4x2xf32> -> vector<4x2xf32>
      %cst_24 = arith.constant 0.000000e+00 : f32
      %26 = vector.broadcast %cst_24 : f32 to vector<4x2xf32>
      %27 = arith.maximumf %25, %26 : vector<4x2xf32>
      %cst_25 = arith.constant dense<0.000000e+00> : vector<64x2xf32>
      %28 = tpu.matmul %24, %27, %cst_25 {dimension_numbers = #tpu.dot_dimension_numbers<[1], [0], [0], [1], [0, 0, 1, 1], [], []>} : vector<64x4xf32>, vector<4x2xf32>, vector<64x2xf32> -> vector<64x2xf32>
      %cst_26 = arith.constant dense<0.000000e+00> : vector<64xf32>
      %29 = vector.multi_reduction <add>, %28, %cst_26 [1] : vector<64x2xf32> to vector<64xf32>
      %30 = vector.shape_cast %29 : vector<64xf32> to vector<64x1xf32>
      %cst_27 = arith.constant 0.000000e+00 : f32
      %31 = vector.broadcast %cst_27 : f32 to vector<64x1xf32>
      %32 = arith.subf %31, %30 : vector<64x1xf32>
      %33 = math.exp %32 : vector<64x1xf32>
      %cst_28 = arith.constant 1.000000e+00 : f32
      %34 = vector.broadcast %cst_28 : f32 to vector<64x1xf32>
      %35 = arith.addf %34, %33 : vector<64x1xf32>
      %cst_29 = arith.constant 1.000000e+00 : f32
      %36 = vector.broadcast %cst_29 : f32 to vector<64x1xf32>
      %37 = arith.divf %36, %35 : vector<64x1xf32>
      %c0_30 = arith.constant 0 : index
      %c0_31 = arith.constant 0 : index
      %c0_32 = arith.constant 0 : index
      %38 = vector.load %arg5[%c0_30, %c0_31, %c0_32] : memref<1x64x1xf32, #tpu.memory_space<vmem>>, vector<1x64x1xf32>
      %39 = vector.shape_cast %38 : vector<1x64x1xf32> to vector<64x1xf32>
      %40 = vector.shape_cast %37 : vector<64x1xf32> to vector<1x64x1xf32>
      tpu.vector_store %arg5[%c0_30, %c0_31, %c0_32], %40 {strides = array<i32>} : memref<1x64x1xf32, #tpu.memory_space<vmem>>, vector<1x64x1xf32>,
    } else {
    }
    return
  }
  func.func @transform_0(%arg0: i32, %arg1: i32) -> (i32, i32, i32) {
    %c0_i32 = arith.constant 0 : i32
    %c0_i32_0 = arith.constant 0 : i32
    return %arg0, %c0_i32, %arg1 : i32, i32, i32
  }
  func.func @transform_1(%arg0: i32, %arg1: i32) -> (i32, i32) {
    %c0_i32 = arith.constant 0 : i32
    %c0_i32_0 = arith.constant 0 : i32
    %c0_i32_1 = arith.constant 0 : i32
    return %c0_i32, %c0_i32_0 : i32, i32
  }
  func.func @transform_2(%arg0: i32, %arg1: i32) -> (i32, i32) {
    %c0_i32 = arith.constant 0 : i32
    %c0_i32_0 = arith.constant 0 : i32
    %c0_i32_1 = arith.constant 0 : i32
    return %c0_i32, %c0_i32_0 : i32, i32
  }
  func.func @transform_3(%arg0: i32, %arg1: i32) -> (i32, i32, i32) {
    %c0_i32 = arith.constant 0 : i32
    %c0_i32_0 = arith.constant 0 : i32
    %c0_i32_1 = arith.constant 0 : i32
    return %arg0, %c0_i32, %c0_i32_0 : i32, i32, i32
  }
}

</mosaic_0001>

<bundles_post_ra>
// kernel: tpu_custom_call.1
= control target key start
LH: loop header
LB: loop body
LE: loop exit
PB: predicated region body
PF: predicated region fallthrough
CT: control target
= control target key end

     0   :  { %8 = vsyncpa [#allocation5], 0  ;;  %s1344_s0 = inlined_call_operand.hbm [shape: f32[2,64,256], index: 0, kind: input, shape index: {}]   ;;  %s1345_s1 = inlined_call_operand.vmem [shape: f32[4,64], index: 1, kind: input, shape index: {}]   ;;  %s1346_s2 = inlined_call_operand.vmem [shape: f32[64,4], index: 2, kind: input, shape index: {}]   ;;  %s1347_s3 = inlined_call_operand.vmem [shape: f32[2,64,1], index: 3, kind: output, shape index: {}]  }
   0x1   :  { %10 = vsyncpa [#allocation5 + $0x1], 0  ;;  %s1098_s12 = smov 0   ;;  %s1100_s13 = smov 0  }
   0x2   :  { %s1102_s14 = smov 0   ;;  %s1104_s15 = smov 0  }
   0x3   :  { %s1106_s16 = smov 0   ;;  %s1108_s17 = smov 0  }
   0x4 LB: > { %s786_s18 = sadd.s32 4294967295, %s1068_s17   ;;  %s28_s19 = sadd.s32 1, %s1064_s16  ;;  %s1068_s17 = sphi %s1108_s17, %s16_s17   ;;  %s1064_s16 = sphi %s1106_s16, %s1355_s16   ;;  %s1060_s15 = sphi %s1104_s15, %s1354_s15   ;;  %s1056_s14 = sphi %s1102_s14, %s1353_s14   ;;  %s1052_s13 = sphi %s1100_s13, %s1352_s13   ;;  %s1048_s12 = sphi %s1098_s12, %s1351_s12  }
   0x5   : > { %p30_p0 = scmp.ge.s32.totalorder %s28_s19, 2  ;;  %s37_s20 = sadd.s32 1, %s1056_s14 }
   0x6   : > { %p44_p1 = scmp.ne.s32.totalorder %s1056_s14, %s1052_s13  ;;  %p45_p2 = scmp.eq.s32.totalorder %s1068_s17, 0 }
   0x7   : > { %s1357_s19 = smov (%p30_p0, %s28_s19), 0  ;;  %p50_p4 = scmp.ne.s32.totalorder %s1052_s13, %s1048_s12 }
   0x8   : > { %p1134_p3 = por %p45_p2, %p44_p1  ;;  %s32_s22 = ssub.s32 %s1064_s16, %s1357_s19 }
   0x9   : > { %p51_p5 = scmp.eq.s32.totalorder %s786_s18, 0  ;;  %p35_p6 = scmp.eq.s32.totalorder %s32_s22, 0 }
   0xa   : > { %p880_p8 = scmp.lt.s32.totalorder %s1068_s17, 2  ;;  %s148_s25 = sand.u32 1, %s1056_s14  }
   0xb   : > { %p1141_p7 = por %p51_p5, %p50_p4  ;;  %s809_s26 = sshll.u32 %s1064_s16, 11 }
   0xc   : > { %s1147_s24 = scalar_select %p35_p6, %s1056_s14, %s37_s20  }
   0xd   : > { %s790_s27 = sshll.u32 %s148_s25, 7  ;;  %s1154_s30 = scalar_lea.hbm %s1344_s0, %s809_s26 }
   0xe   : > { %s152_s4 = scalar_lea.vmem [#allocation4], %s790_s27  ;;  %p1158_p9 = pnand %p880_p8, %p1134_p3 }
   0xf   : > { %s161_s5 = sshll.u32 %s152_s4, 4  ;;  %s1164_s7 = scalar_lea.sflag [#allocation5], %s148_s25  ;;  %s1162_s5 = int_to_ptr.vmem [resolvable:$true] %s161_s5 }
  0x10   : > { %s988_s8 = scalar_lea.hbm %s1154_s30, 2048  ;;  %p990_p11 = pneg %p1158_p9 }
  0x11   : > { %p989_p10 = scmp.ne.s32.totalorder %s1154_s30, %s988_s8  ;;  %s993_s11 = scalar_lea.hbm %s1344_s0, 4096 }
  0x12   : > { %p994_p0 = scmp.lt.u32.totalorder %s1154_s30, %s1344_s0  ;;  %p995_p1 = scmp.lt.u32.totalorder %s993_s11, %s988_s8 }
  0x13   : > { %p991_p12 = pnand %p990_p11, %p989_p10  ;;  %p997_p3 = scmp.lt.u32.totalorder %s988_s8, %s1154_s30 }
  0x14   : > { %p996_p2 = por %p995_p1, %p994_p0 }
  0x15   : > { %p992_p13 = pneg %p991_p12 }
  0x16   : > { %p998_p4 = por %p997_p3, %p996_p2 }
  0x18   : > { %p999_p5 = pnand %p998_p4, %p992_p13 }
  0x1a   : > { %1002 = shalt.err (!%p999_p5)
}
  0x1b   : > { %s1003_s20 = scalar_lea.vmem %s1162_s5, 2048  ;;  %s1070_s21 = smov [#allocation4]  }
  0x1c   : > { %p1004_p6 = scmp.ne.s32.totalorder %s1162_s5, %s1003_s20  ;;  %s1008_s22 = sshll.u32 %s1070_s21, 4  ;;  %s1009_s22 = int_to_ptr.vmem [resolvable:$false] %s1008_s22 }
  0x1d   : > { %s1010_s25 = scalar_lea.vmem %s1009_s22, 4096  ;;  %p1011_p12 = scmp.lt.s32.totalorder %s1162_s5, %s1009_s22 }
  0x1e   : > { %p1006_p8 = pnand %p1004_p6, %p990_p11  ;;  %p1012_p0 = scmp.lt.s32.totalorder %s1010_s25, %s1003_s20 }
  0x20   : > { %p1007_p10 = pneg %p1006_p8  ;;  %p1013_p1 = por %p1012_p0, %p1011_p12 }
  0x22   : > { %p1014_p2 = pnand %p1013_p1, %p1007_p10 }
  0x24   : > { %1017 = shalt.err (!%p1014_p2)
}
  0x25   : > { %s1071_s26 = smov 256   ;;  %s1072_s27 = smov 16  }
  0x26   : > { %879 = dma.hbm_to_vmem [thread:$0]  (!%p1158_p9), %s1154_s30, 2048, %s1162_s5, %s1164_s7, %s1071_s26, %s1071_s26, %s1072_s27  }
  0x27   : > { %p793_p11 = scmp.ge.s32.totalorder %s1068_s17, 1  ;;  %p169_p13 = scmp.lt.s32.totalorder %s1068_s17, 3 }
  0x29   : > { %p170_p3 = pnand %p793_p11, %p169_p13 }
  0x2a   : > { %s175_s28 = sand.u32 (!%p170_p3), 1, %s1052_s13  }
  0x2b   : > { %173 = sbr.rel (%p170_p3) target bundleno = 965 (0x3c5), region = 32  ;;  %s794_s29 = sshll.u32 (!%p170_p3), %s175_s28, 7 }
  0x2c   : > { %s176_s4 = scalar_lea.sflag (!%p170_p3), [#allocation5], %s175_s28  ;;  %s1195_s8 = scalar_lea.vmem (!%p170_p3), [#allocation4], %s794_s29 }
  0x32   : > { %1043 = dma.done.wait (%p1141_p7), %s176_s4, 2048  }
  0x33   : > { %1045 = vsyncadd (%p1141_p7), %s176_s4, 4294965248  ;;  %vm212_vm0 = vcmask 7168   ;;  %v1073_v0 = vmov -inf   ;;  %v233_v1 = vld [vmem:[%s1195_s8 + $0x20] sm:$0xff]  ;;  %v234_v2 = vld [vmem:[%s1195_s8 + $0x28] sm:$0xff]  ;;  %v1074_v33 = vmov 0.0  }
  0x34   : > { %223 = vst.msk [vmem:[#allocation3 + $0x10] sm:$0xff] %vm212_vm0, %v1073_v0  ;;  %221 = vst.msk [vmem:[#allocation3] sm:$0xff] %vm212_vm0, %v1073_v0  ;;  %v229_v3 = vld [vmem:[%s1195_s8] sm:$0xff]  ;;  %v308_v4 = vmax.f32 %v233_v1, %v234_v2  ;;  %v230_v5 = vld [vmem:[%s1195_s8 + $0x8] sm:$0xff]  ;;  %v259_v28 = vadd.f32 %v234_v2, %v233_v1  ;;  %v1075_v51 = vmov 0.0|0.0   ;;  %s1076_s23 = smov 1  }
  0x35   : > { %222 = vst.msk [vmem:[#allocation3 + $0x8] sm:$0xff] %vm212_vm0, %v1073_v0  ;;  %224 = vst.msk [vmem:[#allocation3 + $0x18] sm:$0xff] %vm212_vm0, %v1073_v0  ;;  %v235_v6 = vld [vmem:[%s1195_s8 + $0x30] sm:$0xff]  ;;  %v236_v7 = vld [vmem:[%s1195_s8 + $0x38] sm:$0xff]  ;;  %v302_v8 = vmax.f32 %v229_v3, %v230_v5  ;;  %v253_v26 = vadd.f32 %v230_v5, %v229_v3  ;;  %862 = vmatprep.subr.bf16.mxu0 %v1075_v51  ;;  %vm1077_vm1 = vmmov 0   ;;  %vm418_vm2 = vcmask 523264  }
  0x36   : > { %225 = vst.msk [vmem:[#allocation3 + $0x20] sm:$0xff] %vm212_vm0, %v1073_v0  ;;  %226 = vst.msk [vmem:[#allocation3 + $0x28] sm:$0xff] %vm212_vm0, %v1073_v0  ;;  %v231_v9 = vld [vmem:[%s1195_s8 + $0x10] sm:$0xff]  ;;  %v232_v10 = vld [vmem:[%s1195_s8 + $0x18] sm:$0xff]  ;;  %309 = vmax.xlane.f32.xlu1 %v308_v4  ;;  %v311_v11 = vmax.f32 %v235_v6, %v236_v7  ;;  %v262_v27 = vadd.f32 %v236_v7, %v235_v6  ;;  %845 = vmatprep.mubr.msk.f32.mxu0 %vm1077_vm1, %v1074_v33  ;;  %vm493_vm3 = vcmask 31744   ;;  %vm518_vm4 = vcmask 1043456  }
  0x37   : > { %227 = vst.msk [vmem:[#allocation3 + $0x30] sm:$0xff] %vm212_vm0, %v1073_v0  ;;  %228 = vst.msk [vmem:[#allocation3 + $0x38] sm:$0xff] %vm212_vm0, %v1073_v0  ;;  %303 = vmax.xlane.f32.xlu0 %v302_v8  ;;  %v305_v12 = vmax.f32 %v231_v9, %v232_v10  ;;  %v239_v13 = vld [vmem:[%s1195_s8 + $0x50] sm:$0xff]  ;;  %v240_v14 = vld [vmem:[%s1195_s8 + $0x58] sm:$0xff]  ;;  %v256_v25 = vadd.f32 %v232_v10, %v231_v9  ;;  %vm627_vm5 = vcmask 15360   ;;  %p203_p7 = scmp.lt.s32.totalorder %s1060_s15, 1 }
  0x38   : > { %v237_v15 = vld [vmem:[%s1195_s8 + $0x40] sm:$0xff]  ;;  %v238_v16 = vld [vmem:[%s1195_s8 + $0x48] sm:$0xff]  ;;  %v317_v17 = vmax.f32 %v239_v13, %v240_v14  ;;  %v243_v19 = vld [vmem:[%s1195_s8 + $0x70] sm:$0xff]  ;;  %v268_v29 = vadd.f32 %v240_v14, %v239_v13  ;;  %214 = vst.msk [vmem:[#allocation2 + $0x8] sm:$0xff] %vm212_vm0, %v1074_v33 }
  0x39   : > { %v314_v18 = vmax.f32 %v237_v15, %v238_v16  ;;  %v244_v20 = vld [vmem:[%s1195_s8 + $0x78] sm:$0xff]  ;;  %v241_v21 = vld [vmem:[%s1195_s8 + $0x60] sm:$0xff]  ;;  %v242_v22 = vld [vmem:[%s1195_s8 + $0x68] sm:$0xff]  ;;  %v265_v30 = vadd.f32 %v238_v16, %v237_v15  ;;  %213 = vst.msk [vmem:[#allocation2] sm:$0xff] %vm212_vm0, %v1074_v33  ;;  %s1359_s15 = smov (!%p203_p7, %s1060_s15), 1 }
  0x3a   : > { %312 = vmax.xlane.f32.xlu1 %v311_v11  ;;  %v323_v23 = vmax.f32 %v243_v19, %v244_v20  ;;  %v320_v24 = vmax.f32 %v241_v21, %v242_v22  ;;  %v274_v31 = vadd.f32 %v244_v20, %v243_v19  ;;  %v271_v32 = vadd.f32 %v242_v22, %v241_v21  ;;  %s810_s8 = sshll.u32 %s1359_s15, 6 }
  0x3b   : > { %306 = vmax.xlane.f32.xlu0 %v305_v12  ;;  %215 = vst.msk [vmem:[#allocation2 + $0x10] sm:$0xff] %vm212_vm0, %v1074_v33  ;;  %216 = vst.msk [vmem:[#allocation2 + $0x18] sm:$0xff] %vm212_vm0, %v1074_v33  ;;  %v296_v34 = vld [vmem:[#allocation3 + $0x10] sm:$0xff]  ;;  %v294_v35 = vld [vmem:[#allocation3] sm:$0xff]  ;;  %s207_s5 = scalar_lea.vmem %s1347_s3, %s810_s8 }
  0x3c   : > { %217 = vst.msk [vmem:[#allocation2 + $0x20] sm:$0xff] %vm212_vm0, %v1074_v33  ;;  %218 = vst.msk [vmem:[#allocation2 + $0x28] sm:$0xff] %vm212_vm0, %v1074_v33  ;;  %v297_v40 = vld [vmem:[#allocation3 + $0x18] sm:$0xff]  ;;  %v295_v41 = vld [vmem:[#allocation3 + $0x8] sm:$0xff] }
  0x3d   : > { %219 = vst.msk [vmem:[#allocation2 + $0x30] sm:$0xff] %vm212_vm0, %v1074_v33  ;;  %220 = vst.msk [vmem:[#allocation2 + $0x38] sm:$0xff] %vm212_vm0, %v1074_v33  ;;  %v299_v46 = vld [vmem:[#allocation3 + $0x28] sm:$0xff]  ;;  %v298_v47 = vld [vmem:[#allocation3 + $0x20] sm:$0xff] }
  0x3e   : > { %318 = vmax.xlane.f32.xlu1 %v317_v17  ;;  %v301_v53 = vld [vmem:[#allocation3 + $0x38] sm:$0xff]  ;;  %v300_v54 = vld [vmem:[#allocation3 + $0x30] sm:$0xff] }
  0x3f   : > { %315 = vmax.xlane.f32.xlu0 %v314_v18  ;;  %v246_v61 = vld [vmem:[#allocation2 + $0x8] sm:$0xff] }
  0x40   : > { %v245_v1 = vld [vmem:[#allocation2] sm:$0xff] }
  0x42   : > { %324 = vmax.xlane.f32.xlu1 %v323_v23  ;;  %v248_v8 = vld [vmem:[#allocation2 + $0x18] sm:$0xff]  ;;  %v247_v10 = vld [vmem:[#allocation2 + $0x10] sm:$0xff] }
  0x43   : > { %321 = vmax.xlane.f32.xlu0 %v320_v24  ;;  %v250_v17 = vld [vmem:[#allocation2 + $0x28] sm:$0xff]  ;;  %v249_v19 = vld [vmem:[#allocation2 + $0x20] sm:$0xff] }
  0x46   : > { %257 = vadd.xlane.f32.xlu1 %v256_v25  ;;  %v252_v25 = vld [vmem:[#allocation2 + $0x38] sm:$0xff] }
  0x47   : > { %254 = vadd.xlane.f32.xlu0 %v253_v26  ;;  %v251_v26 = vld [vmem:[#allocation2 + $0x30] sm:$0xff] }
  0x4a   : > { %263 = vadd.xlane.f32.xlu1 %v262_v27 }
  0x4b   : > { %260 = vadd.xlane.f32.xlu0 %v259_v28 }
  0x4e   : > { %269 = vadd.xlane.f32.xlu1 %v268_v29 }
  0x4f   : > { %266 = vadd.xlane.f32.xlu0 %v265_v30 }
  0x52   : > { %275 = vadd.xlane.f32.xlu1 %v274_v31 }
  0x53   : > { %272 = vadd.xlane.f32.xlu0 %v271_v32 }
  0xc3   : > { %v310_v36 = vpop.xlane.xlu1 %309 }
  0xc4   : > { %v328_v37 = vmax.f32 %v296_v34, %v310_v36  ;;  %v304_v38 = vpop.xlane.xlu0 %303 }
  0xc5   : > { %v326_v39 = vmax.f32 %v294_v35, %v304_v38 }
  0xc6   : > { %336 = vst.msk [vmem:[#allocation3 + $0x10] sm:$0xff] %vm212_vm0, %v328_v37 }
  0xc7   : > { %334 = vst.msk [vmem:[#allocation3] sm:$0xff] %vm212_vm0, %v326_v39  ;;  %v313_v42 = vpop.xlane.xlu1 %312 }
  0xc8   : > { %v329_v43 = vmax.f32 %v297_v40, %v313_v42  ;;  %v307_v44 = vpop.xlane.xlu0 %306 }
  0xc9   : > { %v327_v45 = vmax.f32 %v295_v41, %v307_v44 }
  0xca   : > { %337 = vst.msk [vmem:[#allocation3 + $0x18] sm:$0xff] %vm212_vm0, %v329_v43 }
  0xcb   : > { %335 = vst.msk [vmem:[#allocation3 + $0x8] sm:$0xff] %vm212_vm0, %v327_v45  ;;  %v319_v48 = vpop.xlane.xlu1 %318 }
  0xcc   : > { %v331_v49 = vmax.f32 %v299_v46, %v319_v48  ;;  %v316_v50 = vpop.xlane.xlu0 %315 }
  0xcd   : > { %v330_v52 = vmax.f32 %v298_v47, %v316_v50  ;;  %v363_v56 = vld [vmem:[#allocation3 + $0x10] sm:$0xff] }
  0xce   : > { %339 = vst.msk [vmem:[#allocation3 + $0x28] sm:$0xff] %vm212_vm0, %v331_v49  ;;  %v361_v63 = vld [vmem:[#allocation3] sm:$0xff] }
  0xcf   : > { %338 = vst.msk [vmem:[#allocation3 + $0x20] sm:$0xff] %vm212_vm0, %v330_v52  ;;  %v325_v55 = vpop.xlane.xlu1 %324 }
  0xd0   : > { %v333_v57 = vmax.f32 %v301_v53, %v325_v55  ;;  %v322_v58 = vpop.xlane.xlu0 %321 }
  0xd1   : > { %v332_v59 = vmax.f32 %v300_v54, %v322_v58  ;;  %v364_v60 = vld [vmem:[#allocation3 + $0x18] sm:$0xff] }
  0xd2   : > { %341 = vst.msk [vmem:[#allocation3 + $0x38] sm:$0xff] %vm212_vm0, %v333_v57  ;;  %v941_v62 = vpack.i.bf16 %v364_v60, %v363_v56  ;;  %v362_v0 = vld [vmem:[#allocation3 + $0x8] sm:$0xff] }
  0xd3   : > { %340 = vst.msk [vmem:[#allocation3 + $0x30] sm:$0xff] %vm212_vm0, %v332_v59  ;;  %v936_v2 = vpack.i.bf16 %v362_v0, %v361_v63  ;;  %v258_v3 = vpop.xlane.xlu1 %257 }
  0xd4   : > { %942 = vrot.lane.b32.xlu1 %v941_v62, %s1076_s23  ;;  %v278_v4 = vadd.f32 %v258_v3, %v246_v61  ;;  %v255_v5 = vpop.xlane.xlu0 %254 }
  0xd5   : > { %937 = vrot.lane.b32.xlu0 %v936_v2, %s1076_s23  ;;  %v366_v6 = vld [vmem:[#allocation3 + $0x28] sm:$0xff]  ;;  %v277_v7 = vadd.f32 %v255_v5, %v245_v1 }
  0xd6   : > { %v365_v9 = vld [vmem:[#allocation3 + $0x20] sm:$0xff]  ;;  %287 = vst.msk [vmem:[#allocation2 + $0x8] sm:$0xff] %vm212_vm0, %v278_v4 }
  0xd7   : > { %v946_v11 = vpack.i.bf16 %v366_v6, %v365_v9  ;;  %286 = vst.msk [vmem:[#allocation2] sm:$0xff] %vm212_vm0, %v277_v7  ;;  %v264_v12 = vpop.xlane.xlu1 %263  ;;  %v410_v9 = vld [vmem:[%s1346_s2] sm:$0xff] }
  0xd8   : > { %v280_v13 = vadd.f32 %v264_v12, %v248_v8  ;;  %v261_v14 = vpop.xlane.xlu0 %260  ;;  %v409_v8 = vld [vmem:[%s1345_s1] sm:$0xf]  ;;  %850 = vmatprep.mubr.msk.f32.mxu1 %vm493_vm3, %v410_v9 }
  0xd9   : > { %947 = vrot.lane.b32.xlu1 %v946_v11, %s1076_s23  ;;  %v368_v15 = vld [vmem:[#allocation3 + $0x38] sm:$0xff]  ;;  %v279_v16 = vadd.f32 %v261_v14, %v247_v10 }
  0xda   : > { %v367_v18 = vld [vmem:[#allocation3 + $0x30] sm:$0xff]  ;;  %289 = vst.msk [vmem:[#allocation2 + $0x18] sm:$0xff] %vm212_vm0, %v280_v13  ;;  %v413_v14 = vld [vmem:[%s1346_s2 + $0x18] sm:$0xff] }
  0xdb   : > { %v951_v20 = vpack.i.bf16 %v368_v15, %v367_v18  ;;  %288 = vst.msk [vmem:[#allocation2 + $0x10] sm:$0xff] %vm212_vm0, %v279_v16  ;;  %v270_v21 = vpop.xlane.xlu1 %269  ;;  %v412_v13 = vld [vmem:[%s1346_s2 + $0x10] sm:$0xff]  ;;  %v414_v15 = vld [vmem:[%s1346_s2 + $0x20] sm:$0xff]  ;;  %v415_v16 = vld [vmem:[%s1346_s2 + $0x28] sm:$0xff] }
  0xdc   : > { %v282_v22 = vadd.f32 %v270_v21, %v250_v17  ;;  %v267_v23 = vpop.xlane.xlu0 %266  ;;  %v416_v17 = vld [vmem:[%s1346_s2 + $0x30] sm:$0xff]  ;;  %v417_v18 = vld [vmem:[%s1346_s2 + $0x38] sm:$0xff] }
  0xdd   : > { %952 = vrot.lane.b32.xlu1 %v951_v20, %s1076_s23  ;;  %v281_v24 = vadd.f32 %v267_v23, %v249_v19  ;;  %v346_v32 = vld [vmem:[#allocation2 + $0x8] sm:$0xff] }
  0xde   : > { %291 = vst.msk [vmem:[#allocation2 + $0x28] sm:$0xff] %vm212_vm0, %v282_v22  ;;  %v345_v31 = vld [vmem:[#allocation2] sm:$0xff]  ;;  %v354_v37 = vmul.f32 0.00390625, %v346_v32 }
  0xdf   : > { %290 = vst.msk [vmem:[#allocation2 + $0x20] sm:$0xff] %vm212_vm0, %v281_v24  ;;  %v276_v27 = vpop.xlane.xlu1 %275  ;;  %v353_v36 = vmul.f32 0.00390625, %v345_v31 }
  0xe0   : > { %v284_v28 = vadd.f32 %v276_v27, %v252_v25  ;;  %v273_v29 = vpop.xlane.xlu0 %272 }
  0xe1   : > { %v283_v30 = vadd.f32 %v273_v29, %v251_v26  ;;  %v348_v33 = vld [vmem:[#allocation2 + $0x18] sm:$0xff] }
  0xe2   : > { %293 = vst.msk [vmem:[#allocation2 + $0x38] sm:$0xff] %vm212_vm0, %v284_v28  ;;  %v347_v38 = vld [vmem:[#allocation2 + $0x10] sm:$0xff]  ;;  %v356_v39 = vmul.f32 0.00390625, %v348_v33 }
  0xe3   : > { %292 = vst.msk [vmem:[#allocation2 + $0x30] sm:$0xff] %vm212_vm0, %v283_v30  ;;  %v355_v47 = vmul.f32 0.00390625, %v347_v38 }
  0xe5   : > { %v350_v44 = vld [vmem:[#allocation2 + $0x28] sm:$0xff] }
  0xe6   : > { %v349_v50 = vld [vmem:[#allocation2 + $0x20] sm:$0xff]  ;;  %v358_v52 = vmul.f32 0.00390625, %v350_v44 }
  0xe7   : > { %v357_v58 = vmul.f32 0.00390625, %v349_v50 }
  0xe9   : > { %v352_v57 = vld [vmem:[#allocation2 + $0x38] sm:$0xff] }
  0xea   : > { %v351_v61 = vld [vmem:[#allocation2 + $0x30] sm:$0xff]  ;;  %v360_v62 = vmul.f32 0.00390625, %v352_v57 }
  0xeb   : > { %v359_v3 = vmul.f32 0.00390625, %v351_v61 }
 0x146   : > { %v943_v34 = vpop.permute.xlu1 %942 }
 0x147   : > { %v938_v35 = vpop.permute.xlu0 %937  ;;  %v945_v40 = vunpack.i.h.bf16 %v943_v34  ;;  %v944_v41 = vunpack.i.l.bf16 %v943_v34 }
 0x148   : > { %v940_v42 = vunpack.i.h.bf16 %v938_v35  ;;  %v939_v43 = vunpack.i.l.bf16 %v938_v35 }
 0x149   : > { %v403_v55 = vsel %vm212_vm0, %v355_v47, %v944_v41  ;;  %v404_v56 = vsel %vm212_vm0, %v356_v39, %v945_v40 }
 0x14a   : > { %v401_v45 = vsel %vm212_vm0, %v353_v36, %v939_v43  ;;  %v402_v46 = vsel %vm212_vm0, %v354_v37, %v940_v42  ;;  %v866_v60 = vpack.c.bf16 %v404_v56, %v403_v55 }
 0x14b   : > { %v948_v48 = vpop.permute.xlu1 %947  ;;  %v863_v49 = vpack.c.bf16 %v402_v46, %v401_v45 }
 0x14c   : > { %v950_v53 = vunpack.i.h.bf16 %v948_v48  ;;  %v949_v54 = vunpack.i.l.bf16 %v948_v48 }
 0x14d   : > { %864 = vmatpush3.bf16.msra.mxu0 %v863_v49 }
 0x14e   : > { %865 = vmatprep.subr.bf16.mxu0 %v1075_v51  ;;  %v405_v1 = vsel %vm212_vm0, %v357_v58, %v949_v54  ;;  %v406_v2 = vsel %vm212_vm0, %v358_v52, %v950_v53 }
 0x14f   : > { %v953_v59 = vpop.permute.xlu1 %952  ;;  %v869_v4 = vpack.c.bf16 %v406_v2, %v405_v1 }
 0x150   : > { %v955_v63 = vunpack.i.h.bf16 %v953_v59  ;;  %v954_v0 = vunpack.i.l.bf16 %v953_v59 }
 0x151   : > { %867 = vmatpush3.bf16.msra.mxu0 %v866_v60 }
 0x152   : > { %868 = vmatprep.subr.bf16.mxu0 %v1075_v51  ;;  %v407_v5 = vsel %vm212_vm0, %v359_v3, %v954_v0  ;;  %v408_v6 = vsel %vm212_vm0, %v360_v62, %v955_v63 }
 0x153   : > { %v872_v7 = vpack.c.bf16 %v408_v6, %v407_v5 }
 0x155   : > { %870 = vmatpush3.bf16.msra.mxu0 %v869_v4 }
 0x156   : > { %871 = vmatprep.subr.bf16.mxu0 %v1075_v51  ;;  %v411_v51 = vld [vmem:[%s1346_s2 + $0x8] sm:$0xff] }
 0x159   : > { %873 = vmatpush3.bf16.msra.mxu0 %v872_v7 }
 0x15c   : > { %846 = vmatmul.mubr.msk.f32.vlgmr.msra.gmra.mrb[0].mxu0 %vm418_vm2, %v409_v8 }
 0x22f   : > { %v488_v10 = vpop.f32.mrb[0].mxu0 }
 0x230   : > { %v492_v11 = vmax.f32 %v488_v10, 0.0  ;;  %v847_v12 = vpop.f32.mrb[1].mxu0 }
 0x232   : > { %848 = vmatprep.subr.msk.mxu1 %vm518_vm4, %v492_v11 }
 0x233   : > { %849 = vmatpush3.msk.msra.mxu1 %vm518_vm4, %v492_v11 }
 0x234   : > { %851 = vmatmul.mubr.msk.f32.vlgmr.msra.gmra.mrb[0].mxu1 %vm493_vm3, %v411_v51 }
 0x235   : > { %853 = vmatprep.mubr.msk.f32.mxu1 %vm493_vm3, %v412_v13 }
 0x238   : > { %854 = vmatmul.mubr.msk.f32.gmra.mrb[2].mxu1 %vm493_vm3, %v413_v14 }
 0x239   : > { %856 = vmatprep.mubr.msk.f32.mxu1 %vm493_vm3, %v414_v15 }
 0x23c   : > { %857 = vmatmul.mubr.msk.f32.gmra.mrb[4].mxu1 %vm493_vm3, %v415_v16 }
 0x23d   : > { %859 = vmatprep.mubr.msk.f32.mxu1 %vm493_vm3, %v416_v17 }
 0x240   : > { %860 = vmatmul.mubr.msk.f32.gmra.mrb[6].mxu1 %vm493_vm3, %v417_v18 }
 0x307   : > { %v852_v19 = vpop.f32.mrb[0].mxu1 }
 0x308   : > { %v588_v20 = vpop.f32.mrb[1].mxu1  ;;  %v631_v21 = vsel %vm627_vm5, %v852_v19, 0.0 }
 0x309   : > { %632 = vadd.xlane.f32.xlu1 %v631_v21  ;;  %v628_v22 = vsel %vm627_vm5, %v588_v20, 0.0 }
 0x30a   : > { %629 = vadd.xlane.f32.xlu0 %v628_v22 }
 0x30b   : > { %v855_v23 = vpop.f32.mrb[2].mxu1 }
 0x30c   : > { %v598_v24 = vpop.f32.mrb[3].mxu1  ;;  %v637_v25 = vsel %vm627_vm5, %v855_v23, 0.0 }
 0x30d   : > { %v634_v29 = vsel %vm627_vm5, %v598_v24, 0.0 }
 0x30e   : > { %638 = vadd.xlane.f32.xlu0 %v637_v25 }
 0x30f   : > { %v858_v26 = vpop.f32.mrb[4].mxu1 }
 0x310   : > { %v608_v27 = vpop.f32.mrb[5].mxu1  ;;  %v643_v28 = vsel %vm627_vm5, %v858_v26, 0.0 }
 0x311   : > { %644 = vadd.xlane.f32.xlu1 %v643_v28  ;;  %v640_v30 = vsel %vm627_vm5, %v608_v27, 0.0 }
 0x312   : > { %635 = vadd.xlane.f32.xlu0 %v634_v29 }
 0x313   : > { %v861_v31 = vpop.f32.mrb[6].mxu1 }
 0x314   : > { %v618_v32 = vpop.f32.mrb[7].mxu1  ;;  %v649_v33 = vsel %vm627_vm5, %v861_v31, 0.0 }
 0x315   : > { %650 = vadd.xlane.f32.xlu1 %v649_v33  ;;  %v646_v34 = vsel %vm627_vm5, %v618_v32, 0.0 }
 0x316   : > { %641 = vadd.xlane.f32.xlu0 %v640_v30 }
 0x31a   : > { %647 = vadd.xlane.f32.xlu0 %v646_v34 }
 0x396   : > { %v633_v35 = vpop.xlane.xlu1 %632 }
 0x397   : > { %v653_v36 = vsub.f32 0.0, %v633_v35  ;;  %v630_v37 = vpop.xlane.xlu0 %629 }
 0x398   : > { %v652_v38 = vsub.f32 0.0, %v630_v37 }
 0x399   : > { %v662_v39 = vmul.f32 1.442695, %v653_v36 }
 0x39a   : > { %v660_v40 = vmul.f32 1.442695, %v652_v38 }
 0x39b   : > { %956 = vpow2.f32 %v662_v39  ;;  %v639_v41 = vpop.xlane.xlu0 %638 }
 0x39c   : > { %958 = vpow2.f32 %v660_v40  ;;  %v655_v42 = vsub.f32 0.0, %v639_v41 }
 0x39e   : > { %v666_v43 = vmul.f32 1.442695, %v655_v42  ;;  %v645_v44 = vpop.xlane.xlu1 %644 }
 0x39f   : > { %v636_v45 = vpop.xlane.xlu0 %635  ;;  %v657_v46 = vsub.f32 0.0, %v645_v44 }
 0x3a0   : > { %960 = vpow2.f32 %v666_v43  ;;  %v654_v47 = vsub.f32 0.0, %v636_v45 }
 0x3a1   : > { %v670_v48 = vmul.f32 1.442695, %v657_v46 }
 0x3a2   : > { %v664_v49 = vmul.f32 1.442695, %v654_v47  ;;  %v651_v50 = vpop.xlane.xlu1 %650 }
 0x3a3   : > { %962 = vpow2.f32 %v670_v48  ;;  %v642_v52 = vpop.xlane.xlu0 %641  ;;  %v659_v53 = vsub.f32 0.0, %v651_v50 }
 0x3a4   : > { %964 = vpow2.f32 %v664_v49  ;;  %v656_v54 = vsub.f32 0.0, %v642_v52 }
 0x3a5   : > { %v957_v55 = vpop.eup %956  ;;  %v674_v56 = vmul.f32 1.442695, %v659_v53 }
 0x3a6   : > { %v959_v57 = vpop.eup %958  ;;  %v677_v58 = vadd.f32 1.0, %v957_v55  ;;  %v668_v59 = vmul.f32 1.442695, %v656_v54 }
 0x3a7   : > { %v676_v60 = vadd.f32 1.0, %v959_v57  ;;  %966 = vpow2.f32 %v674_v56  ;;  %v648_v61 = vpop.xlane.xlu0 %647 }
 0x3a8   : > { %968 = vrcp.f32 %v677_v58  ;;  %v658_v62 = vsub.f32 0.0, %v648_v61 }
 0x3a9   : > { %970 = vrcp.f32 %v676_v60 }
 0x3aa   : > { %v961_v63 = vpop.eup %960  ;;  %972 = vpow2.f32 %v668_v59  ;;  %v672_v0 = vmul.f32 1.442695, %v658_v62 }
 0x3ab   : > { %v679_v1 = vadd.f32 1.0, %v961_v63 }
 0x3ac   : > { %974 = vpow2.f32 %v672_v0 }
 0x3ad   : > { %v963_v2 = vpop.eup %962  ;;  %976 = vrcp.f32 %v679_v1 }
 0x3ae   : > { %v965_v3 = vpop.eup %964  ;;  %v681_v4 = vadd.f32 1.0, %v963_v2 }
 0x3af   : > { %v678_v5 = vadd.f32 1.0, %v965_v3 }
 0x3b0   : > { %978 = vrcp.f32 %v681_v4 }
 0x3b1   : > { %v967_v6 = vpop.eup %966  ;;  %980 = vrcp.f32 %v678_v5 }
 0x3b2   : > { %v969_v7 = vpop.eup %968  ;;  %v683_v8 = vadd.f32 1.0, %v967_v6 }
 0x3b3   : > { %v971_v9 = vpop.eup %970  ;;  %701 = vst.msk [vmem:[%s207_s5 + $0x8] sm:$0xff] %vm212_vm0, %v969_v7 }
 0x3b4   : > { %v973_v10 = vpop.eup %972  ;;  %700 = vst.msk [vmem:[%s207_s5] sm:$0xff] %vm212_vm0, %v971_v9  ;;  %982 = vrcp.f32 %v683_v8 }
 0x3b5   : > { %v680_v11 = vadd.f32 1.0, %v973_v10 }
 0x3b6   : > { %v975_v12 = vpop.eup %974 }
 0x3b7   : > { %v977_v51 = vpop.eup %976  ;;  %984 = vrcp.f32 %v680_v11  ;;  %v682_v13 = vadd.f32 1.0, %v975_v12 }
 0x3b8   : > { %703 = vst.msk [vmem:[%s207_s5 + $0x18] sm:$0xff] %vm212_vm0, %v977_v51 }
 0x3b9   : > { %986 = vrcp.f32 %v682_v13 }
 0x3ba   : > { %v979_v14 = vpop.eup %978 }
 0x3bb   : > { %v981_v15 = vpop.eup %980  ;;  %705 = vst.msk [vmem:[%s207_s5 + $0x28] sm:$0xff] %vm212_vm0, %v979_v14 }
 0x3bc   : > { %702 = vst.msk [vmem:[%s207_s5 + $0x10] sm:$0xff] %vm212_vm0, %v981_v15 }
 0x3be   : > { %v983_v16 = vpop.eup %982 }
 0x3bf   : > { %707 = vst.msk [vmem:[%s207_s5 + $0x38] sm:$0xff] %vm212_vm0, %v983_v16 }
 0x3c1   : > { %v985_v17 = vpop.eup %984 }
 0x3c2   : > { %704 = vst.msk [vmem:[%s207_s5 + $0x20] sm:$0xff] %vm212_vm0, %v985_v17 }
 0x3c3   : > { %v987_v18 = vpop.eup %986 }
 0x3c4   : > { %706 = vst.msk [vmem:[%s207_s5 + $0x30] sm:$0xff] %vm212_vm0, %v987_v18 }
 0x3c5 PF: > { %s16_s17 = sadd.s32 1, %s1068_s17   ;;  %s1351_s12 = smov %s1052_s13 }
 0x3c6   : > { %p13_p9 = scmp.ge.s32.totalorder %s16_s17, 4   ;;  %s1352_s13 = smov %s1056_s14 }
 0x3c7   : > { %s1353_s14 = smov %s1147_s24  ;;  %s1354_s15 = smov %s1064_s16 }
 0x3c8   : > { %s1355_s16 = smov %s1357_s19  ;;  %15 = sbr.rel (!%p13_p9) target bundleno = 4 (0x4), region = 80 }
 0x3cf   :  { %729 = vsyncpa [#allocation5], 1 }
 0x3d0   :  { %731 = vsyncpa [#allocation5 + $0x1], 1 }

</bundles_post_ra>
